<compile_context>
chip_gen: v7x
topology: tpu7x:2x2x1
jax: 0.10.0
libtpu: 0.0.40
codegen_flags: <defaults>
</compile_context>

<pallas_src>
import functools

import jax
import jax.numpy as jnp
from jax.experimental import pallas as pl
from jax.experimental.pallas import tpu as pltpu

LN_EPS = 1e-5  # PyTorch nn.LayerNorm default


def _round_up(x, m):
    return ((x + m - 1) // m) * m


def _classifier_kernel(x_ref, gamma_ref, beta_ref, w_ref, b_ref, o_ref):
    # --- LayerNorm over the embed dim, biased variance (PyTorch), all in f32 ---
    x = x_ref[...].astype(jnp.float32)                          # [TB, D]
    mean = jnp.mean(x, axis=-1, keepdims=True)                  # [TB, 1]
    centered = x - mean
    var = jnp.mean(centered * centered, axis=-1, keepdims=True)
    inv = jax.lax.rsqrt(var + LN_EPS)
    y = centered * inv                                          # [TB, D]
    y = y * gamma_ref[...].astype(jnp.float32) + beta_ref[...].astype(jnp.float32)

    # --- Linear head: y @ W + b.  W is [D, TC]; operands in W's dtype
    #     (bf16 on v6e/v7x fast path), accumulate in f32 on the MXU. ---
    y = y.astype(w_ref.dtype)
    out = jnp.dot(y, w_ref[...], preferred_element_type=jnp.float32)  # [TB, TC]
    out = out + b_ref[...].astype(jnp.float32)
    o_ref[...] = out.astype(o_ref.dtype)


def continual_classifier(x, gamma, beta, weight, bias, *,
                         block_b=256, block_c_max=512, mxu_dtype=None):
    """Forward pass of ContinualClassifier (LayerNorm -> Linear).

    Args:
      x:      [B, D] activations.
      gamma:  [D]    LayerNorm weight.
      beta:   [D]    LayerNorm bias.
      weight: [C, D] linear weight (PyTorch layout).
      bias:   [C]    linear bias.
      block_b:     batch tile size (rows per grid step).
      block_c_max: max class tile width (multiple of 128).
      mxu_dtype:   if set (e.g. jnp.bfloat16), matmul operands use this dtype
                   (f32 accumulation); LayerNorm math stays in f32.
    Returns:
      [B, C] logits in x.dtype.
    """
    B, D = x.shape
    C = weight.shape[0]
    op_dtype = x.dtype if mxu_dtype is None else mxu_dtype

    # ---- Class-dim padding / tiling (lane-dense output: multiple of 128) ----
    c128 = _round_up(C, 128)
    if c128 <= block_c_max:
        block_c, c_pad = c128, c128
    else:
        block_c = _round_up(block_c_max, 128)
        c_pad = _round_up(c128, block_c)

    # ---- Batch padding / tiling (sublane multiple of 8) ----
    b8 = _round_up(B, 8)
    block_tb = min(block_b, b8)
    b_pad = _round_up(b8, block_tb)

    # ---- One-time parameter prep (do this at init in a real model). ----
    # TODO(synk): hoist the transpose/pad/cast of `weight`/`bias` out of the
    # per-call path entirely (store params pre-transposed & padded).
    w_t = jnp.zeros((D, c_pad), dtype=op_dtype)
    w_t = w_t.at[:, :C].set(weight.T.astype(op_dtype))          # padded cols are 0
    bias2 = jnp.zeros((1, c_pad), jnp.float32).at[0, :C].set(bias.astype(jnp.float32))
    gamma2 = gamma.reshape(1, D).astype(jnp.float32)
    beta2 = beta.reshape(1, D).astype(jnp.float32)

    x_pad = x if b_pad == B else jnp.pad(x, ((0, b_pad - B), (0, 0)))

    n_bt = b_pad // block_tb
    n_ct = c_pad // block_c
    grid = (n_bt, n_ct)

    itemsize = jnp.dtype(x.dtype).itemsize
    cost = pl.CostEstimate(
        flops=2 * b_pad * D * c_pad + 10 * b_pad * D * n_ct,
        transcendentals=b_pad * n_ct,
        bytes_accessed=(b_pad * D * itemsize                    # x
                        + D * c_pad * jnp.dtype(op_dtype).itemsize  # weight
                        + b_pad * c_pad * itemsize              # logits
                        + 2 * D * 4 + c_pad * 4),               # gamma/beta/bias
    )

    out = pl.pallas_call(
        _classifier_kernel,
        out_shape=jax.ShapeDtypeStruct((b_pad, c_pad), x.dtype),
        grid=grid,
        in_specs=[
            pl.BlockSpec((block_tb, D), lambda i, j: (i, 0)),   # x: const across class tiles
            pl.BlockSpec((1, D), lambda i, j: (0, 0)),          # gamma
            pl.BlockSpec((1, D), lambda i, j: (0, 0)),          # beta
            pl.BlockSpec((D, block_c), lambda i, j: (0, j)),    # weight tile
            pl.BlockSpec((1, block_c), lambda i, j: (0, j)),    # bias tile
        ],
        out_specs=pl.BlockSpec((block_tb, block_c), lambda i, j: (i, j)),
        compiler_params=pltpu.CompilerParams(
            dimension_semantics=("parallel", "parallel"),
            vmem_limit_bytes=64 * 1024 * 1024,
        ),
        cost_estimate=cost,
    )(x_pad, gamma2, beta2, w_t, bias2)

    return out[:B, :C]


def _reference(x, gamma, beta, weight, bias):
    x = x.astype(jnp.float32)
    mean = jnp.mean(x, axis=-1, keepdims=True)
    var = jnp.mean((x - mean) ** 2, axis=-1, keepdims=True)
    xn = (x - mean) / jnp.sqrt(var + LN_EPS)
    y = xn * gamma + beta
    return y @ weight.T.astype(jnp.float32) + bias


if __name__ == "__main__":
    key = jax.random.PRNGKey(0)
    kx, kw, kb, kg, kbt, kx2 = jax.random.split(key, 6)

    # Shapes consistent with the module's forward: x is [batch, embed_dim].
    B, D, C = 8, 32, 10  # batch, embed_dim, nb_classes

    x = jax.random.normal(kx, (B, D), dtype=jnp.float32)
    bound = 1.0 / jnp.sqrt(jnp.float32(D))
    weight = jax.random.uniform(kw, (C, D), minval=-bound, maxval=bound,
                                dtype=jnp.float32)
    bias = jax.random.uniform(kb, (C,), minval=-bound, maxval=bound,
                              dtype=jnp.float32)
    gamma = jnp.ones((D,), jnp.float32) + 0.1 * jax.random.normal(kg, (D,))
    beta = 0.1 * jax.random.normal(kbt, (D,))

    fwd_f32 = jax.jit(functools.partial(continual_classifier, mxu_dtype=None))
    fwd_bf16 = jax.jit(functools.partial(continual_classifier,
                                         mxu_dtype=jnp.bfloat16))

    # --- f32 MXU path: tight tolerance ---
    out = jax.block_until_ready(fwd_f32(x, gamma, beta, weight, bias))
    ref = _reference(x, gamma, beta, weight, bias)
    assert out.shape == (B, C)
    assert jnp.allclose(out, ref, atol=1e-5, rtol=1e-5), (
        f"f32 max abs err {jnp.max(jnp.abs(out - ref))}")

    # --- bf16 MXU-operand path (f32 accumulation, f32 LN): looser tolerance ---
    out_bf = jax.block_until_ready(fwd_bf16(x, gamma, beta, weight, bias))
    assert out_bf.shape == (B, C)
    assert jnp.allclose(out_bf, ref, atol=5e-2, rtol=5e-2), (
        f"bf16 max abs err {jnp.max(jnp.abs(out_bf - ref))}")

    # --- non-multiple-of-8 batch exercises the pad/slice path ---
    B2 = 50
    x2 = jax.random.normal(kx2, (B2, D), dtype=jnp.float32)
    out2 = jax.block_until_ready(fwd_f32(x2, gamma, beta, weight, bias))
    ref2 = _reference(x2, gamma, beta, weight, bias)
    assert out2.shape == (B2, C)
    assert jnp.allclose(out2, ref2, atol=1e-5, rtol=1e-5), (
        f"padded-batch max abs err {jnp.max(jnp.abs(out2 - ref2))}")

    print("KERNEL_OK")
</pallas_src>

<mosaic_0001>
module attributes {stable_mosaic.version = 11 : i64} {
  func.func @_classifier_kernel(%arg0: i32, %arg1: i32, %arg2: memref<8x32xf32, #tpu.memory_space<vmem>>, %arg3: memref<1x32xf32, #tpu.memory_space<vmem>>, %arg4: memref<1x32xf32, #tpu.memory_space<vmem>>, %arg5: memref<32x128xf32, #tpu.memory_space<vmem>>, %arg6: memref<1x128xf32, #tpu.memory_space<vmem>>, %arg7: memref<8x128xf32, #tpu.memory_space<vmem>>) attributes {dimension_semantics = [#tpu.dimension_semantics<parallel>, #tpu.dimension_semantics<parallel>], iteration_bounds = array<i64: 1, 1>, scalar_prefetch = 0 : i64, scratch_operands = 0 : i64, tpu.core_type = #tpu.core_type<tc>, window_params = [{transform_indices = @transform_0, window_bounds = array<i64: 8, 32>}, {pipeline_mode = #tpu.pipeline_mode<synchronous>, transform_indices = @transform_1, window_bounds = array<i64: 1, 32>}, {pipeline_mode = #tpu.pipeline_mode<synchronous>, transform_indices = @transform_2, window_bounds = array<i64: 1, 32>}, {transform_indices = @transform_3, window_bounds = array<i64: 32, 128>}, {transform_indices = @transform_4, window_bounds = array<i64: 1, 128>}, {transform_indices = @transform_5, window_bounds = array<i64: 8, 128>}]} {
    %c0 = arith.constant 0 : index
    %c0_0 = arith.constant 0 : index
    %0 = vector.load %arg2[%c0, %c0_0] : memref<8x32xf32, #tpu.memory_space<vmem>>, vector<8x32xf32>
    %cst = arith.constant dense<0.000000e+00> : vector<8xf32>
    %1 = vector.multi_reduction <add>, %0, %cst [1] : vector<8x32xf32> to vector<8xf32>
    %2 = vector.shape_cast %1 : vector<8xf32> to vector<8x1xf32>
    %cst_1 = arith.constant 3.200000e+01 : f32
    %3 = vector.broadcast %cst_1 : f32 to vector<8x1xf32>
    %4 = arith.divf %2, %3 : vector<8x1xf32>
    %5 = vector.broadcast %4 : vector<8x1xf32> to vector<8x32xf32>
    %6 = arith.subf %0, %5 : vector<8x32xf32>
    %7 = arith.mulf %6, %6 : vector<8x32xf32>
    %cst_2 = arith.constant dense<0.000000e+00> : vector<8xf32>
    %8 = vector.multi_reduction <add>, %7, %cst_2 [1] : vector<8x32xf32> to vector<8xf32>
    %9 = vector.shape_cast %8 : vector<8xf32> to vector<8x1xf32>
    %cst_3 = arith.constant 3.200000e+01 : f32
    %10 = vector.broadcast %cst_3 : f32 to vector<8x1xf32>
    %11 = arith.divf %9, %10 : vector<8x1xf32>
    %cst_4 = arith.constant 9.99999974E-6 : f32
    %12 = vector.broadcast %cst_4 : f32 to vector<8x1xf32>
    %13 = arith.addf %11, %12 : vector<8x1xf32>
    %14 = math.rsqrt %13 : vector<8x1xf32>
    %15 = vector.broadcast %14 : vector<8x1xf32> to vector<8x32xf32>
    %16 = arith.mulf %6, %15 : vector<8x32xf32>
    %c0_5 = arith.constant 0 : index
    %c0_6 = arith.constant 0 : index
    %17 = vector.load %arg3[%c0_5, %c0_6] : memref<1x32xf32, #tpu.memory_space<vmem>>, vector<1x32xf32>
    %18 = vector.broadcast %17 : vector<1x32xf32> to vector<8x32xf32>
    %19 = arith.mulf %16, %18 : vector<8x32xf32>
    %c0_7 = arith.constant 0 : index
    %c0_8 = arith.constant 0 : index
    %20 = vector.load %arg4[%c0_7, %c0_8] : memref<1x32xf32, #tpu.memory_space<vmem>>, vector<1x32xf32>
    %21 = vector.broadcast %20 : vector<1x32xf32> to vector<8x32xf32>
    %22 = arith.addf %19, %21 : vector<8x32xf32>
    %c0_9 = arith.constant 0 : index
    %c0_10 = arith.constant 0 : index
    %23 = vector.load %arg5[%c0_9, %c0_10] : memref<32x128xf32, #tpu.memory_space<vmem>>, vector<32x128xf32>
    %cst_11 = arith.constant dense<0.000000e+00> : vector<8x128xf32>
    %24 = tpu.matmul %22, %23, %cst_11 {dimension_numbers = #tpu.dot_dimension_numbers<[1], [0], [0], [1], [0, 0, 1, 1], [], []>} : vector<8x32xf32>, vector<32x128xf32>, vector<8x128xf32> -> vector<8x128xf32>
    %c0_12 = arith.constant 0 : index
    %c0_13 = arith.constant 0 : index
    %25 = vector.load %arg6[%c0_12, %c0_13] : memref<1x128xf32, #tpu.memory_space<vmem>>, vector<1x128xf32>
    %26 = vector.broadcast %25 : vector<1x128xf32> to vector<8x128xf32>
    %27 = arith.addf %24, %26 : vector<8x128xf32>
    %c0_14 = arith.constant 0 : index
    %c0_15 = arith.constant 0 : index
    %28 = vector.load %arg7[%c0_14, %c0_15] : memref<8x128xf32, #tpu.memory_space<vmem>>, vector<8x128xf32>
    tpu.vector_store %arg7[%c0_14, %c0_15], %27 {strides = array<i32>} : memref<8x128xf32, #tpu.memory_space<vmem>>, vector<8x128xf32>,
    return
  }
  func.func @transform_0(%arg0: i32, %arg1: i32) -> (i32, i32) {
    %c0_i32 = arith.constant 0 : i32
    %c0_i32_0 = arith.constant 0 : i32
    return %arg0, %c0_i32 : i32, i32
  }
  func.func @transform_1(%arg0: i32, %arg1: i32) -> (i32, i32) {
    %c0_i32 = arith.constant 0 : i32
    %c0_i32_0 = arith.constant 0 : i32
    %c0_i32_1 = arith.constant 0 : i32
    return %c0_i32, %c0_i32_0 : i32, i32
  }
  func.func @transform_2(%arg0: i32, %arg1: i32) -> (i32, i32) {
    %c0_i32 = arith.constant 0 : i32
    %c0_i32_0 = arith.constant 0 : i32
    %c0_i32_1 = arith.constant 0 : i32
    return %c0_i32, %c0_i32_0 : i32, i32
  }
  func.func @transform_3(%arg0: i32, %arg1: i32) -> (i32, i32) {
    %c0_i32 = arith.constant 0 : i32
    %c0_i32_0 = arith.constant 0 : i32
    return %c0_i32, %arg1 : i32, i32
  }
  func.func @transform_4(%arg0: i32, %arg1: i32) -> (i32, i32) {
    %c0_i32 = arith.constant 0 : i32
    %c0_i32_0 = arith.constant 0 : i32
    return %c0_i32, %arg1 : i32, i32
  }
  func.func @transform_5(%arg0: i32, %arg1: i32) -> (i32, i32) {
    %c0_i32 = arith.constant 0 : i32
    return %arg0, %arg1 : i32, i32
  }
}

</mosaic_0001>

<bundles_post_ra>
// kernel: continual_classifier.1
= control target key start
LH: loop header
LB: loop body
LE: loop exit
PB: predicated region body
PF: predicated region fallthrough
CT: control target
= control target key end

     0   :  { %10 = vsyncpa [#allocation3], 0  ;;  %s517_s0 = inlined_call_operand.hbm [shape: f32[8,32], index: 0, kind: input, shape index: {}]   ;;  %s518_s1 = inlined_call_operand.hbm [shape: f32[1,32], index: 1, kind: input, shape index: {}]   ;;  %s519_s2 = inlined_call_operand.hbm [shape: f32[1,32], index: 2, kind: input, shape index: {}]   ;;  %s520_s3 = inlined_call_operand.hbm [shape: f32[32,128], index: 3, kind: input, shape index: {}]   ;;  %s521_s4 = inlined_call_operand.hbm [shape: f32[1,128], index: 4, kind: input, shape index: {}]   ;;  %s522_s5 = inlined_call_operand.hbm [shape: f32[8,128], index: 5, kind: output, shape index: {}]  }
   0x1   :  { %11 = vsyncpa [#allocation6], 0 }
   0x2   :  { %12 = vsyncpa [#allocation9], 0 }
   0x3   :  { %13 = vsyncpa [#allocation4], 0  ;;  %s394_s18 = smov [#allocation5]   ;;  %s395_s20 = smov [#allocation8]  }
   0x4   :  { %s30_s19 = sshll.u32 %s394_s18, 4  ;;  %s49_s21 = sshll.u32 %s395_s20, 4  ;;  %s31_s19 = int_to_ptr.vmem [resolvable:$true] %s30_s19  ;;  %s435_s21 = int_to_ptr.vmem [resolvable:$true] %s49_s21 }
   0x5   :  { %s254_s24 = scalar_lea.hbm %s518_s1, 16 }
   0x6   :  { %p255_p0 = scmp.ne.s32.totalorder %s518_s1, %s254_s24  ;;  %p258_p1 = scmp.lt.u32.totalorder %s254_s24, %s518_s1 }
   0x8   :  { %p260_p2 = pnand %p258_p1, %p255_p0 }
   0xa   :  { %263 = shalt.err (!%p260_p2)
}
   0xb   :  { %s264_s29 = scalar_lea.vmem %s31_s19, 16  ;;  %s268_s30 = scalar_lea.vmem %s31_s19, 32 }
   0xc   :  { %p265_p3 = scmp.ne.s32.totalorder %s31_s19, %s264_s29  ;;  %p269_p4 = scmp.lt.s32.totalorder %s31_s19, %s31_s19 }
   0xd   :  { %p270_p5 = scmp.lt.s32.totalorder %s268_s30, %s264_s29 }
   0xf   :  { %p271_p6 = por %p270_p5, %p269_p4 }
  0x11   :  { %p272_p7 = pnand %p271_p6, %p265_p3 }
  0x13   :  { %275 = shalt.err (!%p272_p7)
}
  0x14   :  { %33 = dma.hbm_to_vmem [thread:$0]  %s518_s1, 16, %s31_s19, [#allocation6]  }
  0x15   :  { %s276_s10 = scalar_lea.hbm %s520_s3, 512 }
  0x16   :  { %p277_p8 = scmp.ne.s32.totalorder %s520_s3, %s276_s10  ;;  %p280_p9 = scmp.lt.u32.totalorder %s276_s10, %s520_s3 }
  0x18   :  { %p282_p10 = pnand %p280_p9, %p277_p8 }
  0x1a   :  { %285 = shalt.err (!%p282_p10)
}
  0x1b   :  { %s286_s15 = scalar_lea.vmem %s435_s21, 512  ;;  %p291_p12 = scmp.lt.s32.totalorder %s435_s21, %s435_s21 }
  0x1c   :  { %p287_p11 = scmp.ne.s32.totalorder %s435_s21, %s286_s15  ;;  %p292_p13 = scmp.lt.s32.totalorder %s286_s15, %s286_s15 }
  0x1e   :  { %p293_p0 = por %p292_p13, %p291_p12 }
  0x20   :  { %p294_p1 = pnand %p293_p0, %p287_p11 }
  0x22   :  { %297 = shalt.err (!%p294_p1)
}
  0x23   :  { %s396_s1 = smov 128   ;;  %s397_s16 = smov 8  }
  0x24   :  { %55 = dma.hbm_to_vmem [thread:$0]  %s520_s3, 512, %s435_s21, [#allocation9], %s396_s1, %s396_s1, %s397_s16  }
  0x25   :  { %s398_s19 = smov [#allocation2]   ;;  %s399_s22 = smov [#allocation7]  }
  0x26   :  { %s20_s20 = sshll.u32 %s398_s19, 4  ;;  %s40_s23 = sshll.u32 %s399_s22, 4  ;;  %s21_s20 = int_to_ptr.vmem [resolvable:$true] %s20_s20  ;;  %s41_s23 = int_to_ptr.vmem [resolvable:$true] %s40_s23 }
  0x27   :  { %s298_s26 = scalar_lea.hbm %s517_s0, 128 }
  0x28   :  { %p299_p2 = scmp.ne.s32.totalorder %s517_s0, %s298_s26  ;;  %p302_p3 = scmp.lt.u32.totalorder %s298_s26, %s517_s0 }
  0x2a   :  { %p304_p4 = pnand %p302_p3, %p299_p2 }
  0x2c   :  { %307 = shalt.err (!%p304_p4)
}
  0x2d   :  { %s308_s3 = scalar_lea.vmem %s21_s20, 128  ;;  %p313_p6 = scmp.lt.s32.totalorder %s21_s20, %s21_s20 }
  0x2e   :  { %p309_p5 = scmp.ne.s32.totalorder %s21_s20, %s308_s3  ;;  %p314_p7 = scmp.lt.s32.totalorder %s308_s3, %s308_s3 }
  0x30   :  { %p315_p8 = por %p314_p7, %p313_p6 }
  0x32   :  { %p316_p9 = pnand %p315_p8, %p309_p5 }
  0x34   :  { %319 = shalt.err (!%p316_p9)
}
  0x35   :  { %23 = dma.hbm_to_vmem [thread:$0]  %s517_s0, 128, %s21_s20, [#allocation3]  }
  0x36   :  { %s320_s9 = scalar_lea.hbm %s519_s2, 16 }
  0x37   :  { %p321_p10 = scmp.ne.s32.totalorder %s519_s2, %s320_s9  ;;  %p324_p11 = scmp.lt.u32.totalorder %s320_s9, %s519_s2 }
  0x39   :  { %p326_p12 = pnand %p324_p11, %p321_p10 }
  0x3b   :  { %329 = shalt.err (!%p326_p12)
}
  0x3c   :  { %s330_s14 = scalar_lea.vmem %s41_s23, 16  ;;  %s334_s15 = scalar_lea.vmem %s41_s23, 32 }
  0x3d   :  { %p331_p13 = scmp.ne.s32.totalorder %s41_s23, %s330_s14  ;;  %p335_p0 = scmp.lt.s32.totalorder %s41_s23, %s41_s23 }
  0x3e   :  { %p336_p1 = scmp.lt.s32.totalorder %s334_s15, %s330_s14 }
  0x40   :  { %p337_p2 = por %p336_p1, %p335_p0 }
  0x42   :  { %p338_p3 = pnand %p337_p2, %p331_p13 }
  0x44   :  { %341 = shalt.err (!%p338_p3)
}
  0x45   :  { %43 = dma.hbm_to_vmem [thread:$0]  %s519_s2, 16, %s41_s23, [#allocation6]  }
  0x46   :  { %s400_s16 = smov [#allocation10]   ;;  %s342_s20 = scalar_lea.hbm %s521_s4, 16 }
  0x47   :  { %s62_s17 = sshll.u32 %s400_s16, 4  ;;  %p343_p4 = scmp.ne.s32.totalorder %s521_s4, %s342_s20  ;;  %s63_s17 = int_to_ptr.vmem [resolvable:$true] %s62_s17 }
  0x48   :  { %p346_p5 = scmp.lt.u32.totalorder %s342_s20, %s521_s4 }
  0x4a   :  { %p348_p6 = pnand %p346_p5, %p343_p4 }
  0x4c   :  { %351 = shalt.err (!%p348_p6)
}
  0x4d   :  { %s352_s27 = scalar_lea.vmem %s63_s17, 16  ;;  %s356_s2 = scalar_lea.vmem %s63_s17, 32 }
  0x4e   :  { %p353_p7 = scmp.ne.s32.totalorder %s63_s17, %s352_s27  ;;  %p357_p8 = scmp.lt.s32.totalorder %s63_s17, %s63_s17 }
  0x4f   :  { %p358_p9 = scmp.lt.s32.totalorder %s356_s2, %s352_s27 }
  0x51   :  { %p359_p10 = por %p358_p9, %p357_p8 }
  0x53   :  { %p360_p11 = pnand %p359_p10, %p353_p7 }
  0x55   :  { %363 = shalt.err (!%p360_p11)
}
  0x56   :  { %65 = dma.hbm_to_vmem [thread:$0]  %s521_s4, 16, %s63_s17, [#allocation9]  }
  0x57   :  { %386 = dma.done.wait [#allocation3], 128  }
  0x58   :  { %387 = vsyncadd [#allocation3], 4294967168 }
  0x59   :  { %388 = dma.done.wait [#allocation6], 32  }
  0x5a   :  { %389 = vsyncadd [#allocation6], 4294967264 }
  0x5b   :  { %390 = dma.done.wait [#allocation9], 528  }
  0x5c   :  { %391 = vsyncadd [#allocation9], 4294966768  ;;  %vm82_vm0 = vcmask 261120   ;;  %v81_v0 = vld [vmem:[#allocation2] sm:$0xff]  ;;  %v113_v7 = vld [vmem:[#allocation8] sm:$0xff]  ;;  %v401_v10 = vmov 0.0|0.0  }
  0x5d   :  { %v83_v1 = vsel %vm82_vm0, %v81_v0, 0.0  ;;  %v114_v8 = vld [vmem:[#allocation8 + $0x8] sm:$0xff]  ;;  %v115_v9 = vld [vmem:[#allocation8 + $0x10] sm:$0xff]  ;;  %235 = vmatprep.subr.bf16.mxu0 %v401_v10  ;;  %v116_v12 = vld [vmem:[#allocation8 + $0x18] sm:$0xff]  ;;  %vm402_vm1 = vmmov 0   ;;  %v403_v13 = vmov 0.0  }
  0x5e   :  { %84 = vadd.xlane.f32.xlu0 %v83_v1  ;;  %v236_v11 = vpack.c.bf16 %v114_v8, %v113_v7  ;;  %232 = vmatprep.mubr.msk.f32.mxu0 %vm402_vm1, %v403_v13  ;;  %v239_v14 = vpack.c.bf16 %v116_v12, %v115_v9  ;;  %v215_v19 = vld [vmem:[#allocation5] ss:$0 sm:$0xff]  ;;  %v216_v21 = vld [vmem:[#allocation7] ss:$0 sm:$0xff]  ;;  %v217_v24 = vld [vmem:[#allocation10] ss:$0 sm:$0xff] }
  0x5f   :  { %s404_s4 = smov [#allocation11]  }
  0x60   :  { %237 = vmatpush3.bf16.msra.mxu0 %v236_v11  ;;  %s204_s29 = sshll.u32 %s404_s4, 4  ;;  %s205_s29 = int_to_ptr.vmem [resolvable:$true] %s204_s29 }
  0x61   :  { %238 = vmatprep.subr.bf16.mxu0 %v401_v10  ;;  %s364_s30 = scalar_lea.vmem %s205_s29, 128  ;;  %p369_p13 = scmp.lt.s32.totalorder %s205_s29, %s205_s29 }
  0x62   :  { %p365_p12 = scmp.ne.s32.totalorder %s205_s29, %s364_s30  ;;  %p370_p0 = scmp.lt.s32.totalorder %s364_s30, %s364_s30 }
  0x64   :  { %240 = vmatpush3.bf16.msra.mxu0 %v239_v14  ;;  %p371_p1 = por %p370_p0, %p369_p13 }
  0x66   :  { %p372_p2 = pnand %p371_p1, %p365_p12 }
  0xeb   :  { %v85_v2 = vpop.xlane.xlu0 %84 }
  0xec   :  { %v87_v3 = vmul.f32 0.03125, %v85_v2 }
  0xee   :  { %v88_v4 = vsub.f32 %v81_v0, %v87_v3 }
  0xf0   :  { %v89_v5 = vmul.f32 %v88_v4, %v88_v4 }
  0xf2   :  { %v90_v6 = vsel %vm82_vm0, %v89_v5, 0.0 }
  0xf3   :  { %91 = vadd.xlane.f32.xlu0 %v90_v6 }
 0x180   :  { %v92_v15 = vpop.xlane.xlu0 %91 }
 0x181   :  { %v93_v16 = vmul.f32 0.03125, %v92_v15 }
 0x183   :  { %v94_v17 = vadd.f32 1e-05, %v93_v16 }
 0x185   :  { %252 = vrsqrt.f32 %v94_v17 }
 0x18f   :  { %v253_v18 = vpop.eup %252 }
 0x190   :  { %v96_v20 = vmul.f32 %v253_v18, %v88_v4 }
 0x192   :  { %v104_v22 = vmul.f32 %v215_v19, %v96_v20 }
 0x194   :  { %v112_v23 = vadd.f32 %v216_v21, %v104_v22 }
 0x196   :  { %233 = vmatmul.mubr.msk.f32.vlgmr.msra.gmra.mrb[0].mxu0 %vm82_vm0, %v112_v23 }
 0x269   :  { %v193_v25 = vpop.f32.mrb[0].mxu0 }
 0x26a   :  { %v194_v26 = vadd.f32 %v217_v24, %v193_v25  ;;  %v234_v27 = vpop.f32.mrb[1].mxu0 }
 0x26c   :  { %197 = vst [vmem:[#allocation11] sm:$0xff] %v194_v26 }
 0x26d   :  { %375 = shalt.err (!%p372_p2)
}
 0x26e   :  { %s376_s6 = scalar_lea.hbm %s522_s5, 128 }
 0x26f   :  { %p377_p3 = scmp.ne.s32.totalorder %s522_s5, %s376_s6  ;;  %p380_p4 = scmp.lt.u32.totalorder %s376_s6, %s522_s5 }
 0x271   :  { %p382_p5 = pnand %p380_p4, %p377_p3 }
 0x273   :  { %385 = shalt.err (!%p382_p5)
}
 0x274   :  { %207 = dma.vmem_to_hbm [thread:$0]  %s205_s29, 128, %s522_s5, [#allocation4]  }
 0x275   :  { %392 = dma.done.wait [#allocation4], 128  }
 0x276   :  { %393 = vsyncadd [#allocation4], 4294967168 }
 0x277   :  { %211 = vsyncpa [#allocation3], 1 }
 0x278   :  { %212 = vsyncpa [#allocation6], 1 }
 0x279   :  { %213 = vsyncpa [#allocation9], 1 }
 0x27a   :  { %214 = vsyncpa [#allocation4], 1 }

</bundles_post_ra>
